<compile_context>
chip_gen: v6e
topology: v6e:2x2x1
jax: 0.10.0
libtpu: 0.0.40
codegen_flags: <defaults>
</compile_context>

<pallas_src>
import functools

import jax
import jax.numpy as jnp
from jax import lax
from jax.experimental import pallas as pl
from jax.experimental.pallas import tpu as pltpu


def _round_up(x: int, m: int) -> int:
    return ((x + m - 1) // m) * m


def _cdiv(a: int, b: int) -> int:
    return -(-a // b)


def _detect_vmem_cap_bytes() -> int:
    """Per-core VMEM capacity; conservative fallback if the query fails."""
    try:
        info = pltpu.get_tpu_info()
        cap = int(getattr(info, "vmem_capacity_bytes", 0))
        if cap > 0:
            return cap
    except Exception:
        pass
    return 64 * 1024 * 1024  # v7x per-core VMEM (smallest current generation)


_VMEM_CAP_BYTES = _detect_vmem_cap_bytes()
_ONE_HOT_MAX_V = 2048  # one-hot MXU gather only when the (T, V) one-hot stays small


# ---------------------------------------------------------------------------
# Path A1: small vocab -- VMEM-resident table + one-hot MXU gather.
# ---------------------------------------------------------------------------
def _make_onehot_kernel(T: int, V: int):
    def kernel(ids_ref, w_ref, o_ref):
        # ids_ref: (T, 1) int32 VMEM tile of token ids
        # w_ref:   (V, D) VMEM, constant index_map -> DMA'd once, kept resident
        # o_ref:   (T, D) VMEM output tile
        ids = ids_ref[...]                                     # (T, 1) int32
        cols = lax.broadcasted_iota(jnp.int32, (T, V), 1)      # (T, V)
        one_hot = (cols == ids).astype(w_ref.dtype)            # exactly one 1 per row
        o_ref[...] = jnp.dot(
            one_hot, w_ref[...], preferred_element_type=jnp.float32
        ).astype(o_ref.dtype)

    return kernel


# ---------------------------------------------------------------------------
# Path A2: medium vocab -- VMEM-resident table + unrolled row-copy loop.
# ---------------------------------------------------------------------------
def _make_vmem_copyloop_kernel(T: int):
    def kernel(ids_ref, w_ref, o_ref):
        # ids_ref: SMEM scalar-prefetch (N_pad,) int32 token ids
        # w_ref:   (V, D) VMEM resident table
        # o_ref:   (T, D) VMEM output tile
        base = pl.multiple_of(pl.program_id(0) * T, 16)

        def body(t, carry):
            idx = ids_ref[base + t]
            o_ref[pl.ds(t, 1), :] = w_ref[pl.ds(idx, 1), :]
            return carry

        lax.fori_loop(0, T, body, 0, unroll=8)

    return kernel


# ---------------------------------------------------------------------------
# Path B: large vocab -- table stays in HBM, windowed per-row DMA gather.
# ---------------------------------------------------------------------------
def _make_hbm_gather_direct_kernel(T: int, W: int):
    # 32-bit dtypes: each (1, D) row is whole VMEM lines -> DMA straight into
    # the output tile; no staging buffer, no per-row VMEM load+store.
    def kernel(ids_ref, w_hbm, o_ref, sems):
        base = pl.multiple_of(pl.program_id(0) * T, 16)

        def start(t):
            idx = ids_ref[base + t]
            pltpu.make_async_copy(
                w_hbm.at[pl.ds(idx, 1), :],
                o_ref.at[pl.ds(t, 1), :],
                sems.at[t % W],
            ).start()

        def wait(t):
            # Descriptor only used for byte-count bookkeeping on wait; every
            # row slice has identical shape, so rebuilding it with row 0 is OK.
            pltpu.make_async_copy(
                w_hbm.at[pl.ds(0, 1), :],
                o_ref.at[pl.ds(t, 1), :],
                sems.at[t % W],
            ).wait()

        for t in range(min(W, T)):   # prime the in-flight window
            start(t)

        def body(t, carry):
            wait(t)

            @pl.when(t + W < T)
            def _():
                start(t + W)

            return carry

        lax.fori_loop(0, T, body, 0, unroll=8)

    return kernel


def _make_hbm_gather_staged_kernel(T: int, W: int):
    # Packed (<32-bit) dtypes: stage each row in a sublane-aligned buffer and
    # vector-store it into the output tile.
    def kernel(ids_ref, w_hbm, o_ref, row_buf, sems):
        base = pl.multiple_of(pl.program_id(0) * T, 16)

        def start(t):
            idx = ids_ref[base + t]
            pltpu.make_async_copy(
                w_hbm.at[pl.ds(idx, 1), :], row_buf.at[t % W], sems.at[t % W]
            ).start()

        def wait(t):
            pltpu.make_async_copy(
                w_hbm.at[pl.ds(0, 1), :], row_buf.at[t % W], sems.at[t % W]
            ).wait()

        for t in range(min(W, T)):
            start(t)

        def body(t, carry):
            wait(t)
            o_ref[pl.ds(t, 1), :] = row_buf[t % W]

            @pl.when(t + W < T)
            def _():
                start(t + W)

            return carry

        lax.fori_loop(0, T, body, 0, unroll=8)

    return kernel


# ---------------------------------------------------------------------------
# Wrapper
# ---------------------------------------------------------------------------
def _choose_tile_tokens(n_tokens: int, row_bytes: int) -> int:
    # ~2 MiB output tiles, clamped to [256, 2048], multiple of 16 (bf16 sublane
    # packing), but never more tokens than we actually have.
    t = _round_up(_cdiv(2 * 1024 * 1024, row_bytes), 16)
    t = max(256, min(2048, t))
    t = min(t, _round_up(n_tokens, 16))
    return max(t, 16)


def _embedding_lookup_call(ids, weight, force_hbm_gather, prefer_exact_gather):
    N = ids.shape[0]
    V, D = weight.shape  # D already padded to a multiple of 128 by the caller
    itemsize = jnp.dtype(weight.dtype).itemsize
    row_bytes = D * itemsize
    table_bytes = V * row_bytes

    vmem_cap = _VMEM_CAP_BYTES
    vmem_limit = min(vmem_cap - (8 << 20), int(vmem_cap * 0.90))
    budget = vmem_limit - (2 << 20)  # headroom for compiler-internal scratch

    T = _choose_tile_tokens(N, row_bytes)

    # --- Path selection ----------------------------------------------------
    use_onehot = False
    if (not force_hbm_gather) and (not prefer_exact_gather) and V <= _ONE_HOT_MAX_V:
        # Cap T so the (T, V) iota + one-hot intermediates stay modest.
        t_cap = max(16, ((4 << 20) // (V * (4 + itemsize))) // 16 * 16)
        T_oh = min(T, t_cap)
        need = (2 * table_bytes            # resident table (double-buffered)
                + 2 * T_oh * row_bytes     # output tile (double-buffered)
                + 2 * T_oh * 4             # ids tile
                + T_oh * V * (4 + itemsize))
        if need <= budget:
            use_onehot = True
            T = T_oh

    use_vmem_loop = False
    if (not force_hbm_gather) and (not use_onehot):
        need = 2 * table_bytes + 2 * T * row_bytes + (1 << 20)
        use_vmem_loop = need <= budget

    N_pad = _round_up(N, T)
    if N_pad != N:
        ids = jnp.pad(ids, (0, N_pad - N))  # pad with id 0 (valid row), sliced off below
    grid = (N_pad // T,)
    out_shape = jax.ShapeDtypeStruct((N_pad, D), weight.dtype)
    cparams = pltpu.CompilerParams(
        dimension_semantics=("parallel",),   # each output tile written exactly once
        vmem_limit_bytes=vmem_limit,
    )

    if use_onehot:
        # NOTE: single-buffering the constant-index table (pl.Buffered(1)) would
        # halve its VMEM footprint; kept double-buffered here for portability.
        ids2d = ids.reshape(N_pad, 1)
        out = pl.pallas_call(
            _make_onehot_kernel(T, V),
            out_shape=out_shape,
            grid=grid,
            in_specs=[
                pl.BlockSpec((T, 1), lambda i: (i, 0)),
                pl.BlockSpec((V, D), lambda i: (0, 0)),  # constant -> fetched once
            ],
            out_specs=pl.BlockSpec((T, D), lambda i: (i, 0)),
            compiler_params=cparams,
        )(ids2d, weight)
    elif use_vmem_loop:
        out = pl.pallas_call(
            _make_vmem_copyloop_kernel(T),
            out_shape=out_shape,
            grid_spec=pltpu.PrefetchScalarGridSpec(
                num_scalar_prefetch=1,  # ids land in SMEM, readable per token
                grid=grid,
                in_specs=[pl.BlockSpec((V, D), lambda i, ids: (0, 0))],
                out_specs=pl.BlockSpec((T, D), lambda i, ids: (i, 0)),
            ),
            compiler_params=cparams,
        )(ids, weight)
    else:
        # Row-size-scaled DMA window: enough rows in flight to cover latency.
        W = max(8, min(32, _cdiv(512 * 1024, row_bytes)))
        W = min(W, T)
        if itemsize >= 4:
            kern = _make_hbm_gather_direct_kernel(T, W)
            scratch = [pltpu.SemaphoreType.DMA((W,))]
        else:
            kern = _make_hbm_gather_staged_kernel(T, W)
            scratch = [pltpu.VMEM((W, 1, D), weight.dtype),
                       pltpu.SemaphoreType.DMA((W,))]
        out = pl.pallas_call(
            kern,
            out_shape=out_shape,
            grid_spec=pltpu.PrefetchScalarGridSpec(
                num_scalar_prefetch=1,
                grid=grid,
                in_specs=[pl.BlockSpec(memory_space=pl.ANY)],  # table stays in HBM
                out_specs=pl.BlockSpec((T, D), lambda i, ids: (i, 0)),
                scratch_shapes=scratch,
            ),
            compiler_params=cparams,
        )(ids, weight)

    return out[:N] if N_pad != N else out


@functools.partial(jax.jit,
                   static_argnames=("force_hbm_gather", "prefer_exact_gather"))
def embedding_forward(token_ids: jax.Array, weight: jax.Array, *,
                      force_hbm_gather: bool = False,
                      prefer_exact_gather: bool = False) -> jax.Array:
    """Equivalent of PyTorch `self.weight[token_ids]`."""
    V, D = weight.shape
    lead_shape = token_ids.shape
    # Bounds safety: clamp ids so data-dependent DMAs never leave the table.
    # (PyTorch raises on OOB ids; here they map to the nearest valid row.)
    ids_flat = jnp.clip(token_ids.reshape(-1).astype(jnp.int32), 0, V - 1)

    # Lane-dense writeback: pad the embedding dim to a multiple of 128 so the
    # (T, D) output stores are unmasked vst, then slice the pad columns off.
    D_pad = _round_up(D, 128)
    w = weight if D_pad == D else jnp.pad(weight, ((0, 0), (0, D_pad - D)))

    # TODO(synk): for extremely large token counts the SMEM scalar-prefetch of
    # all ids (paths A2/B) could be replaced by per-tile SMEM id blocks.
    out_flat = _embedding_lookup_call(ids_flat, w, force_hbm_gather,
                                      prefer_exact_gather)
    if D_pad != D:
        out_flat = out_flat[:, :D]
    return out_flat.reshape(*lead_shape, D)


def init_embedding_weight(key, num_embeddings: int, embedding_dim: int,
                          dtype=jnp.float32) -> jax.Array:
    # Matches torch.nn.init.trunc_normal_ defaults: mean=0, std=1, a=-2, b=2.
    return jax.random.truncated_normal(
        key, -2.0, 2.0, (num_embeddings, embedding_dim)
    ).astype(dtype)


if __name__ == "__main__":
    key = jax.random.PRNGKey(0)
    k_w, k_ids, k_ids2 = jax.random.split(key, 3)

    num_embeddings = 64      # vocab size
    embedding_dim = 128      # lane-dense embedding dim
    batch, seq = 2, 8

    weight = init_embedding_weight(k_w, num_embeddings, embedding_dim)
    token_ids = jax.random.randint(k_ids, (batch, seq), 0, num_embeddings,
                                   dtype=jnp.int32)
    ref = weight[token_ids]

    # Path A1: one-hot MXU gather (default for small vocabs).  Tolerant check:
    # MXU f32 matmuls may use multi-pass bf16 decomposition depending on
    # chip/compiler; table rows differ by O(1), so atol=2e-2 still catches any
    # wrong-row gather while being robust to matmul rounding.
    out_a = jax.block_until_ready(embedding_forward(token_ids, weight))
    assert out_a.shape == (batch, seq, embedding_dim)
    assert out_a.dtype == weight.dtype
    assert jnp.allclose(out_a, ref, rtol=0.0, atol=2e-2), "one-hot MXU path mismatch"

    # Path A2: VMEM-resident table + unrolled copy loop (bit-exact gather).
    out_e = jax.block_until_ready(
        embedding_forward(token_ids, weight, prefer_exact_gather=True))
    assert jnp.array_equal(out_e, ref), "VMEM copy-loop path mismatch"

    # Path B: HBM windowed-DMA gather direct into the output tile (forced).
    out_b = jax.block_until_ready(
        embedding_forward(token_ids, weight, force_hbm_gather=True))
    assert jnp.array_equal(out_b, ref), "HBM-gather path mismatch"

    # Ragged token count (exercises the pad-to-tile + slice path, one-hot).
    token_ids_r = jax.random.randint(k_ids2, (2, 7), 0, num_embeddings,
                                     dtype=jnp.int32)
    out_r = jax.block_until_ready(embedding_forward(token_ids_r, weight))
    assert jnp.allclose(out_r, weight[token_ids_r], rtol=0.0, atol=2e-2), \
        "ragged path mismatch"

    print("KERNEL_OK")
</pallas_src>

<mosaic_0001>
module attributes {stable_mosaic.version = 11 : i64} {
  func.func @kernel(%arg0: i32, %arg1: memref<16x1xi32, #tpu.memory_space<vmem>>, %arg2: memref<64x128xf32, #tpu.memory_space<vmem>>, %arg3: memref<16x128xf32, #tpu.memory_space<vmem>>) attributes {dimension_semantics = [#tpu.dimension_semantics<parallel>], iteration_bounds = array<i64: 1>, scalar_prefetch = 0 : i64, scratch_operands = 0 : i64, tpu.core_type = #tpu.core_type<tc>, window_params = [{transform_indices = @transform_0, window_bounds = array<i64: 16, 1>}, {pipeline_mode = #tpu.pipeline_mode<synchronous>, transform_indices = @transform_1, window_bounds = array<i64: 64, 128>}, {transform_indices = @transform_2, window_bounds = array<i64: 16, 128>}]} {
    %c0 = arith.constant 0 : index
    %c0_0 = arith.constant 0 : index
    %0 = vector.load %arg1[%c0, %c0_0] : memref<16x1xi32, #tpu.memory_space<vmem>>, vector<16x1xi32>
    %1 = tpu.iota {dimensions = array<i32: 1>} : vector<16x64xi32>
    %2 = vector.broadcast %0 : vector<16x1xi32> to vector<16x64xi32>
    %3 = arith.cmpi eq, %1, %2 : vector<16x64xi32>
    %4 = arith.extui %3 : vector<16x64xi1> to vector<16x64xi32>
    %5 = arith.sitofp %4 : vector<16x64xi32> to vector<16x64xf32>
    %c0_1 = arith.constant 0 : index
    %c0_2 = arith.constant 0 : index
    %6 = vector.load %arg2[%c0_1, %c0_2] : memref<64x128xf32, #tpu.memory_space<vmem>>, vector<64x128xf32>
    %cst = arith.constant dense<0.000000e+00> : vector<16x128xf32>
    %7 = tpu.matmul %5, %6, %cst {dimension_numbers = #tpu.dot_dimension_numbers<[1], [0], [0], [1], [0, 0, 1, 1], [], []>} : vector<16x64xf32>, vector<64x128xf32>, vector<16x128xf32> -> vector<16x128xf32>
    %c0_3 = arith.constant 0 : index
    %c0_4 = arith.constant 0 : index
    %8 = vector.load %arg3[%c0_3, %c0_4] : memref<16x128xf32, #tpu.memory_space<vmem>>, vector<16x128xf32>
    tpu.vector_store %arg3[%c0_3, %c0_4], %7 {strides = array<i32>} : memref<16x128xf32, #tpu.memory_space<vmem>>, vector<16x128xf32>,
    return
  }
  func.func @transform_0(%arg0: i32) -> (i32, i32) {
    %c0_i32 = arith.constant 0 : i32
    %c0_i32_0 = arith.constant 0 : i32
    return %arg0, %c0_i32 : i32, i32
  }
  func.func @transform_1(%arg0: i32) -> (i32, i32) {
    %c0_i32 = arith.constant 0 : i32
    %c0_i32_0 = arith.constant 0 : i32
    %c0_i32_1 = arith.constant 0 : i32
    return %c0_i32, %c0_i32_0 : i32, i32
  }
  func.func @transform_2(%arg0: i32) -> (i32, i32) {
    %c0_i32 = arith.constant 0 : i32
    %c0_i32_0 = arith.constant 0 : i32
    return %arg0, %c0_i32 : i32, i32
  }
}

</mosaic_0001>

<bundles_post_ra>
// kernel: embedding_forward.1
= control target key start
LH: loop header
LB: loop body
LE: loop exit
PB: predicated region body
PF: predicated region fallthrough
CT: control target
= control target key end

     0   :  { %7 = vsyncpa [#allocation3], 0  ;;  %s274_s0 = inlined_call_operand.vmem [shape: s32[16,1], index: 0, kind: input, shape index: {}]   ;;  %s275_s1 = inlined_call_operand.hbm [shape: f32[64,128], index: 1, kind: input, shape index: {}]   ;;  %s276_s2 = inlined_call_operand.hbm [shape: f32[16,128], index: 2, kind: output, shape index: {}]  }
   0x1   :  { %8 = vsyncpa [#allocation4], 0  ;;  %s235_s9 = smov [#allocation2]  }
   0x2   :  { %s16_s10 = sshll.u32 %s235_s9, 4  ;;  %s17_s10 = int_to_ptr.vmem [resolvable:$true] %s16_s10 }
   0x3   :  { %s199_s11 = scalar_lea.vmem %s17_s10, 1024  ;;  %p204_p1 = scmp.lt.s32.totalorder %s17_s10, %s17_s10 }
   0x4   :  { %p200_p0 = scmp.ne.s32.totalorder %s17_s10, %s199_s11  ;;  %p205_p2 = scmp.lt.s32.totalorder %s199_s11, %s199_s11 }
   0x6   :  { %p206_p3 = por %p205_p2, %p204_p1 }
   0x8   :  { %p207_p4 = pnand %p206_p3, %p200_p0 }
   0xa   :  { %210 = shalt.err (!%p207_p4)
}
   0xb   :  { %s236_s12 = smov 128   ;;  %s237_s13 = smov 8  }
   0xc   :  { %22 = dma.hbm_to_vmem [thread:$0]  %s275_s1, 1024, %s17_s10, [#allocation3], %s236_s12, %s236_s12, %s237_s13  }
   0xd   :  { %231 = dma.done.wait [#allocation3], 1024  }
   0xe   :  { %232 = vsyncadd [#allocation3], 4294966272  ;;  %v238_v0 = vmov 0   ;;  %v26_v1 = vld [vmem:[%s274_s0] sm:$0xff]  ;;  %v49_v2 = vld [vmem:[#allocation2 + $0x38] sm:$0xff]  ;;  %v28_v11 = vlaneseq  ;;  %vm50_vm0 = vcmask 523264  }
   0xf   :  { %190 = vset.pattern.permute.xlu0 %v238_v0  ;;  %165 = vmatprep.subr.mxu0 %v49_v2  ;;  %v48_v3 = vld [vmem:[#allocation2 + $0x30] sm:$0xff]  ;;  %v27_v4 = vld [vmem:[%s274_s0 + $0x8] sm:$0xff]  ;;  %v46_v6 = vld [vmem:[#allocation2 + $0x20] sm:$0xff]  ;;  %v239_v14 = vmov 0.0   ;;  %s240_s0 = smov [#allocation5]  }
  0x10   :  { %31 = vperm.xlu0 %190, %v26_v1   ;;  %166 = vmatpush3.msra.mxu0 %v49_v2  ;;  %v47_v5 = vld [vmem:[#allocation2 + $0x28] sm:$0xff]  ;;  %v45_v7 = vld [vmem:[#allocation2 + $0x18] sm:$0xff]  ;;  %v44_v8 = vld [vmem:[#allocation2 + $0x10] sm:$0xff]  ;;  %v29_v12 = vand.u32 127, %v28_v11  ;;  %s139_s1 = sshll.u32 %s240_s0, 4  ;;  %s140_s1 = int_to_ptr.vmem [resolvable:$true] %s139_s1 }
  0x11   :  { %167 = vmatprep.subr.mxu0 %v48_v3  ;;  %v43_v9 = vld [vmem:[#allocation2 + $0x8] sm:$0xff]  ;;  %v42_v10 = vld [vmem:[#allocation2] sm:$0xff]  ;;  %s211_s20 = scalar_lea.vmem %s140_s1, 256  ;;  %p216_p6 = scmp.lt.s32.totalorder %s140_s1, %s140_s1 }
  0x12   :  { %168 = vmatpush3.msra.mxu0 %v48_v3  ;;  %p212_p5 = scmp.ne.s32.totalorder %s140_s1, %s211_s20  ;;  %p217_p7 = scmp.lt.s32.totalorder %s211_s20, %s211_s20 }
  0x13   :  { %169 = vmatprep.subr.mxu0 %v47_v5 }
  0x14   :  { %34 = vperm.xlu0 %190, %v27_v4   ;;  %170 = vmatpush3.msra.mxu0 %v47_v5  ;;  %p218_p8 = por %p217_p7, %p216_p6 }
  0x15   :  { %171 = vmatprep.subr.mxu0 %v46_v6 }
  0x16   :  { %172 = vmatpush3.msra.mxu0 %v46_v6  ;;  %p219_p9 = pnand %p218_p8, %p212_p5 }
  0x17   :  { %173 = vmatprep.subr.mxu0 %v45_v7 }
  0x18   :  { %174 = vmatpush3.msra.mxu0 %v45_v7 }
  0x19   :  { %175 = vmatprep.subr.mxu0 %v44_v8 }
  0x1a   :  { %176 = vmatpush3.msra.mxu0 %v44_v8 }
  0x1b   :  { %177 = vmatprep.subr.mxu0 %v43_v9 }
  0x1c   :  { %178 = vmatpush3.msra.mxu0 %v43_v9 }
  0x1d   :  { %179 = vmatprep.subr.mxu0 %v42_v10 }
  0x1e   :  { %180 = vmatpush3.msra.mxu0 %v42_v10 }
  0x8b   :  { %v32_v13 = vpop.permute.xlu0 %31 }
  0x8c   :  { %vm36_vm1 = vcmp.eq.s32.totalorder %v29_v12, %v32_v13 }
  0x8d   :  { %v151_v15 = vsel %vm36_vm1, 1.0, %v239_v14 }
  0x8e   :  { %181 = vmatprep.mubr.msk.f32.mxu0 %vm50_vm0, %v151_v15 }
  0x8f   :  { %v35_v16 = vpop.permute.xlu0 %34 }
  0x90   :  { %vm37_vm2 = vcmp.eq.s32.totalorder %v29_v12, %v35_v16 }
  0x91   :  { %v152_v17 = vsel %vm37_vm2, 1.0, %v239_v14 }
  0x92   :  { %182 = vmatmul.mubr.msk.f32.vlgmr.msra.gmra.mxu0 %vm50_vm0, %v152_v17 }
 0x152   :  { %v183_v18 = vpop.f32.mrf.mxu0 }
 0x153   :  { %133 = vst [vmem:[#allocation5 + $0x8] sm:$0xff] %v183_v18 }
 0x154   :  { %v123_v19 = vpop.f32.mrf.mxu0 }
 0x155   :  { %132 = vst [vmem:[#allocation5] sm:$0xff] %v123_v19 }
 0x156   :  { %222 = shalt.err (!%p219_p9)
}
 0x157   :  { %145 = dma.vmem_to_hbm [thread:$0]  %s140_s1, 256, %s276_s2, [#allocation4], %s236_s12, %s236_s12, %s237_s13  }
 0x158   :  { %233 = dma.done.wait [#allocation4], 256  }
 0x159   :  { %234 = vsyncadd [#allocation4], 4294967040 }
 0x15a   :  { %149 = vsyncpa [#allocation3], 1 }
 0x15b   :  { %150 = vsyncpa [#allocation4], 1 }

</bundles_post_ra>
